<compile_context>
chip_gen: v7x
topology: tpu7x:2x2x1
jax: 0.10.0
libtpu: 0.0.40
codegen_flags: <defaults>
</compile_context>

<pallas_src>
import functools

import jax
import jax.numpy as jnp
from jax import lax
from jax.experimental import pallas as pl
from jax.experimental.pallas import tpu as pltpu


def _round_up(n, m):
    return ((n + m - 1) // m) * m


# ---------------------------------------------------------------------------
# Fused 2-layer dilated-conv kernel.
#   x_ref  : (B, T, Cin)             input, channels on lanes
#   w0_ref : (K*Cin_pad, C1_pad)     layer-0 packed weights
#   b0_ref : (1, C1_pad)             layer-0 bias (lane-major row)
#   w1_ref : (K*C1_pad, C2_pad)      layer-1 packed weights
#   b1_ref : (1, C2_pad)             layer-1 bias
#   o_ref  : (B*T, C2_pad)           lane-dense output
#   xp_s   : (B, lead0+T+pad0, Cin_pad) VMEM scratch (layer-0 input + halo)
#   hp_s   : (B, lead1+T+pad1, C1_pad)  VMEM scratch (layer-0 output + halo)
# ---------------------------------------------------------------------------
def _tap_stack(src_ref, *, B, T, K, dil, start):
    """Read K dilated taps (each (B,T,Cpad)) from a zero-padded scratch ref and
    stack them along the lane/contraction axis -> (B*T, K*Cpad)."""
    cpad = src_ref.shape[-1]
    taps = [
        src_ref[:, start + j * dil: start + j * dil + T, :].reshape(B * T, cpad)
        for j in range(K)
    ]
    return jnp.concatenate(taps, axis=1)


def _fused2_kernel(x_ref, w0_ref, b0_ref, w1_ref, b1_ref, o_ref, xp_s, hp_s,
                   *, B, T, K, Cin, dil0, pad0, lead0, dil1, pad1, lead1):
    c1_pad = hp_s.shape[-1]

    # Stage the input into a zero-filled scratch: channel-pad to 128 lanes and
    # give the time axis its zero halo.  Valid rows start at the sublane-aligned
    # offset `lead0`, so the bulk store is unmasked.
    xp_s[...] = jnp.zeros_like(xp_s)
    xp_s[:, lead0:lead0 + T, :Cin] = x_ref[...]

    # Layer 0: K dilated taps collapsed into one MXU matmul, f32 accumulate.
    x0 = _tap_stack(xp_s, B=B, T=T, K=K, dil=dil0, start=lead0 - pad0)
    h = jnp.dot(x0, w0_ref[...], preferred_element_type=jnp.float32) + b0_ref[...]

    # Layer-0 activation stays in VMEM: stage into the layer-1 halo scratch.
    hp_s[...] = jnp.zeros_like(hp_s)
    hp_s[:, lead1:lead1 + T, :] = h.reshape(B, T, c1_pad)

    # Layer 1: same pattern, deeper contraction (K * 128 = 384).
    x1 = _tap_stack(hp_s, B=B, T=T, K=K, dil=dil1, start=lead1 - pad1)
    out = jnp.dot(x1, w1_ref[...], preferred_element_type=jnp.float32) + b1_ref[...]
    o_ref[...] = out.astype(o_ref.dtype)


# ---------------------------------------------------------------------------
# Parameter init (matches torch.nn.Conv1d default init) and one-time packing
# into padded, MXU-friendly matrices.
# ---------------------------------------------------------------------------
def init_two_sided_dilconv1d_params(key, in_dim=39, kernel_size=3, layers=2):
    params = []
    for i in range(layers):
        cin = in_dim * kernel_size ** i
        cout = in_dim * kernel_size ** (i + 1)
        key, kw, kb = jax.random.split(key, 3)
        bound = 1.0 / jnp.sqrt(cin * kernel_size)
        w = jax.random.uniform(kw, (cout, cin, kernel_size),
                               minval=-bound, maxval=bound, dtype=jnp.float32)
        b = jax.random.uniform(kb, (cout,),
                               minval=-bound, maxval=bound, dtype=jnp.float32)
        params.append((w, b))
    return params


def pack_two_sided_dilconv1d_params(params, kernel_size=3):
    """Repack torch-layout (Cout, Cin, K) weights into (K*Cin_pad, Cout_pad)
    matmul RHS matrices (tap-major rows, channels 128-padded) and (1, Cout_pad)
    bias rows.  One-time cost."""
    packed = []
    for (w, b) in params:
        cout, cin, k = w.shape
        assert k == kernel_size
        cin_pad = _round_up(cin, 128)
        cout_pad = _round_up(cout, 128)
        wr = jnp.transpose(w, (2, 1, 0))                               # (K, Cin, Cout)
        wr = jnp.pad(wr, ((0, 0), (0, cin_pad - cin), (0, cout_pad - cout)))
        wp = wr.reshape(k * cin_pad, cout_pad)                         # (K*Cin_pad, Cout_pad)
        bp = jnp.pad(b, (0, cout_pad - cout)).reshape(1, cout_pad)
        packed.append((wp, bp))
    return packed


# ---------------------------------------------------------------------------
# Forward: both layers in a single pallas_call.
# ---------------------------------------------------------------------------
def two_sided_dilconv1d_forward(x, packed_params, *, in_dim, kernel_size=3):
    """x: (B, Cin, T) f32 -> (B, in_dim*k**2, T) f32 (fused 2-layer module)."""
    assert len(packed_params) == 2, "fused kernel implements the default layers=2"
    B, Cin, T = x.shape
    K = kernel_size
    (w0p, b0p), (w1p, b1p) = packed_params

    cin_pad = w0p.shape[0] // K
    c1_pad = w0p.shape[1]
    c2_pad = w1p.shape[1]
    c2 = in_dim * K * K

    dil0, pad0 = 1, (K - 1) // 2
    dil1, pad1 = K, (K * K - K) // 2
    lead0 = _round_up(max(pad0, 1), 8)          # sublane-aligned start of valid rows
    lead1 = _round_up(max(pad1, 1), 8)

    # Layout plumbing only: channels onto the lane axis.
    x_t = jnp.transpose(x, (0, 2, 1))           # (B, T, Cin)

    kernel = functools.partial(
        _fused2_kernel, B=B, T=T, K=K, Cin=Cin,
        dil0=dil0, pad0=pad0, lead0=lead0,
        dil1=dil1, pad1=pad1, lead1=lead1)

    out2d = pl.pallas_call(
        kernel,
        out_shape=jax.ShapeDtypeStruct((B * T, c2_pad), x.dtype),
        grid=(1,),
        in_specs=[
            pl.BlockSpec((B, T, Cin), lambda i: (0, 0, 0)),
            pl.BlockSpec((K * cin_pad, c1_pad), lambda i: (0, 0)),
            pl.BlockSpec((1, c1_pad), lambda i: (0, 0)),
            pl.BlockSpec((K * c1_pad, c2_pad), lambda i: (0, 0)),
            pl.BlockSpec((1, c2_pad), lambda i: (0, 0)),
        ],
        out_specs=pl.BlockSpec((B * T, c2_pad), lambda i: (0, 0)),
        scratch_shapes=[
            pltpu.VMEM((B, lead0 + T + pad0, cin_pad), jnp.float32),
            pltpu.VMEM((B, lead1 + T + pad1, c1_pad), jnp.float32),
        ],
        compiler_params=pltpu.CompilerParams(
            dimension_semantics=("arbitrary",)),
    )(x_t, w0p, b0p, w1p, b1p)

    # Drop channel padding and return in PyTorch NCW layout.
    out = out2d.reshape(B, T, c2_pad)[:, :, :c2]
    return jnp.transpose(out, (0, 2, 1))


# ---------------------------------------------------------------------------
# Pure-JAX reference (lax.conv_general_dilated) mirroring torch.nn.Conv1d.
# ---------------------------------------------------------------------------
def _ref_forward(x, params, kernel_size=3):
    k = kernel_size
    for i, (w, b) in enumerate(params):
        pad = ((k ** (i + 1) - k ** i) // 2) if i > 0 else (k - 1) // 2
        x = lax.conv_general_dilated(
            x, w, window_strides=(1,), padding=[(pad, pad)],
            rhs_dilation=(k ** i,),
            dimension_numbers=("NCH", "OIH", "NCH"))
        x = x + b[None, :, None]
    return x


if __name__ == "__main__":
    key = jax.random.PRNGKey(0)
    kx, kp = jax.random.split(key)

    B, in_dim, T = 2, 39, 16
    kernel_size, layers = 3, 2

    x = jax.random.normal(kx, (B, in_dim, T), dtype=jnp.float32)       # (B, C, T)
    params = init_two_sided_dilconv1d_params(kp, in_dim, kernel_size, layers)
    packed = pack_two_sided_dilconv1d_params(params, kernel_size)

    fwd = jax.jit(functools.partial(two_sided_dilconv1d_forward,
                                    in_dim=in_dim, kernel_size=kernel_size))
    out = jax.block_until_ready(fwd(x, packed))

    expected_cout = in_dim * kernel_size ** layers
    assert out.shape == (B, expected_cout, T), out.shape

    ref = _ref_forward(x, params, kernel_size)
    assert jnp.allclose(out, ref, atol=1e-4, rtol=1e-4), float(jnp.max(jnp.abs(out - ref)))

    print("KERNEL_OK")
</pallas_src>

<mosaic_0001>
module attributes {stable_mosaic.version = 11 : i64} {
  func.func @_fused2_kernel(%arg0: i32, %arg1: memref<2x16x39xf32, #tpu.memory_space<vmem>>, %arg2: memref<384x128xf32, #tpu.memory_space<vmem>>, %arg3: memref<1x128xf32, #tpu.memory_space<vmem>>, %arg4: memref<384x384xf32, #tpu.memory_space<vmem>>, %arg5: memref<1x384xf32, #tpu.memory_space<vmem>>, %arg6: memref<32x384xf32, #tpu.memory_space<vmem>>, %arg7: memref<2x25x128xf32, #tpu.memory_space<vmem>>, %arg8: memref<2x27x128xf32, #tpu.memory_space<vmem>>) attributes {dimension_semantics = [#tpu.dimension_semantics<arbitrary>], iteration_bounds = array<i64: 1>, scalar_prefetch = 0 : i64, scratch_operands = 2 : i64, tpu.core_type = #tpu.core_type<tc>, window_params = [{pipeline_mode = #tpu.pipeline_mode<synchronous>, transform_indices = @transform_0, window_bounds = array<i64: 2, 16, 39>}, {pipeline_mode = #tpu.pipeline_mode<synchronous>, transform_indices = @transform_1, window_bounds = array<i64: 384, 128>}, {pipeline_mode = #tpu.pipeline_mode<synchronous>, transform_indices = @transform_2, window_bounds = array<i64: 1, 128>}, {pipeline_mode = #tpu.pipeline_mode<synchronous>, transform_indices = @transform_3, window_bounds = array<i64: 384, 384>}, {pipeline_mode = #tpu.pipeline_mode<synchronous>, transform_indices = @transform_4, window_bounds = array<i64: 1, 384>}, {pipeline_mode = #tpu.pipeline_mode<synchronous>, transform_indices = @transform_5, window_bounds = array<i64: 32, 384>}]} {
    %cst = arith.constant 0.000000e+00 : f32
    %0 = vector.broadcast %cst : f32 to vector<2x25x128xf32>
    %c0 = arith.constant 0 : index
    %c0_0 = arith.constant 0 : index
    %c0_1 = arith.constant 0 : index
    %1 = vector.load %arg7[%c0, %c0_0, %c0_1] : memref<2x25x128xf32, #tpu.memory_space<vmem>>, vector<2x25x128xf32>
    tpu.vector_store %arg7[%c0, %c0_0, %c0_1], %0 {strides = array<i32>} : memref<2x25x128xf32, #tpu.memory_space<vmem>>, vector<2x25x128xf32>,
    %c0_2 = arith.constant 0 : index
    %c0_3 = arith.constant 0 : index
    %c0_4 = arith.constant 0 : index
    %2 = vector.load %arg1[%c0_2, %c0_3, %c0_4] : memref<2x16x39xf32, #tpu.memory_space<vmem>>, vector<2x16x39xf32>
    %c0_5 = arith.constant 0 : index
    %c8 = arith.constant 8 : index
    %c0_6 = arith.constant 0 : index
    %3 = vector.load %arg7[%c0_5, %c8, %c0_6] : memref<2x25x128xf32, #tpu.memory_space<vmem>>, vector<2x16x39xf32>
    tpu.vector_store %arg7[%c0_5, %c8, %c0_6], %2 {strides = array<i32>} : memref<2x25x128xf32, #tpu.memory_space<vmem>>, vector<2x16x39xf32>,
    %c0_7 = arith.constant 0 : index
    %c7 = arith.constant 7 : index
    %c0_8 = arith.constant 0 : index
    %4 = vector.load %arg7[%c0_7, %c7, %c0_8] : memref<2x25x128xf32, #tpu.memory_space<vmem>>, vector<2x16x128xf32>
    %5 = vector.shape_cast %4 : vector<2x16x128xf32> to vector<32x128xf32>
    %c0_9 = arith.constant 0 : index
    %c8_10 = arith.constant 8 : index
    %c0_11 = arith.constant 0 : index
    %6 = vector.load %arg7[%c0_9, %c8_10, %c0_11] : memref<2x25x128xf32, #tpu.memory_space<vmem>>, vector<2x16x128xf32>
    %7 = vector.shape_cast %6 : vector<2x16x128xf32> to vector<32x128xf32>
    %c0_12 = arith.constant 0 : index
    %c9 = arith.constant 9 : index
    %c0_13 = arith.constant 0 : index
    %8 = vector.load %arg7[%c0_12, %c9, %c0_13] : memref<2x25x128xf32, #tpu.memory_space<vmem>>, vector<2x16x128xf32>
    %9 = vector.shape_cast %8 : vector<2x16x128xf32> to vector<32x128xf32>
    %10 = tpu.concatenate %5, %7, %9 in 1 : vector<32x128xf32>, vector<32x128xf32>, vector<32x128xf32> -> vector<32x384xf32>
    %c0_14 = arith.constant 0 : index
    %c0_15 = arith.constant 0 : index
    %11 = vector.load %arg2[%c0_14, %c0_15] : memref<384x128xf32, #tpu.memory_space<vmem>>, vector<384x128xf32>
    %cst_16 = arith.constant dense<0.000000e+00> : vector<32x128xf32>
    %12 = tpu.matmul %10, %11, %cst_16 {dimension_numbers = #tpu.dot_dimension_numbers<[1], [0], [0], [1], [0, 0, 1, 1], [], []>} : vector<32x384xf32>, vector<384x128xf32>, vector<32x128xf32> -> vector<32x128xf32>
    %c0_17 = arith.constant 0 : index
    %c0_18 = arith.constant 0 : index
    %13 = vector.load %arg3[%c0_17, %c0_18] : memref<1x128xf32, #tpu.memory_space<vmem>>, vector<1x128xf32>
    %14 = vector.broadcast %13 : vector<1x128xf32> to vector<32x128xf32>
    %15 = arith.addf %12, %14 : vector<32x128xf32>
    %cst_19 = arith.constant 0.000000e+00 : f32
    %16 = vector.broadcast %cst_19 : f32 to vector<2x27x128xf32>
    %c0_20 = arith.constant 0 : index
    %c0_21 = arith.constant 0 : index
    %c0_22 = arith.constant 0 : index
    %17 = vector.load %arg8[%c0_20, %c0_21, %c0_22] : memref<2x27x128xf32, #tpu.memory_space<vmem>>, vector<2x27x128xf32>
    tpu.vector_store %arg8[%c0_20, %c0_21, %c0_22], %16 {strides = array<i32>} : memref<2x27x128xf32, #tpu.memory_space<vmem>>, vector<2x27x128xf32>,
    %18 = vector.shape_cast %15 : vector<32x128xf32> to vector<2x16x128xf32>
    %c0_23 = arith.constant 0 : index
    %c8_24 = arith.constant 8 : index
    %c0_25 = arith.constant 0 : index
    %19 = vector.load %arg8[%c0_23, %c8_24, %c0_25] : memref<2x27x128xf32, #tpu.memory_space<vmem>>, vector<2x16x128xf32>
    tpu.vector_store %arg8[%c0_23, %c8_24, %c0_25], %18 {strides = array<i32>} : memref<2x27x128xf32, #tpu.memory_space<vmem>>, vector<2x16x128xf32>,
    %c0_26 = arith.constant 0 : index
    %c5 = arith.constant 5 : index
    %c0_27 = arith.constant 0 : index
    %20 = vector.load %arg8[%c0_26, %c5, %c0_27] : memref<2x27x128xf32, #tpu.memory_space<vmem>>, vector<2x16x128xf32>
    %21 = vector.shape_cast %20 : vector<2x16x128xf32> to vector<32x128xf32>
    %c0_28 = arith.constant 0 : index
    %c8_29 = arith.constant 8 : index
    %c0_30 = arith.constant 0 : index
    %22 = vector.load %arg8[%c0_28, %c8_29, %c0_30] : memref<2x27x128xf32, #tpu.memory_space<vmem>>, vector<2x16x128xf32>
    %23 = vector.shape_cast %22 : vector<2x16x128xf32> to vector<32x128xf32>
    %c0_31 = arith.constant 0 : index
    %c11 = arith.constant 11 : index
    %c0_32 = arith.constant 0 : index
    %24 = vector.load %arg8[%c0_31, %c11, %c0_32] : memref<2x27x128xf32, #tpu.memory_space<vmem>>, vector<2x16x128xf32>
    %25 = vector.shape_cast %24 : vector<2x16x128xf32> to vector<32x128xf32>
    %26 = tpu.concatenate %21, %23, %25 in 1 : vector<32x128xf32>, vector<32x128xf32>, vector<32x128xf32> -> vector<32x384xf32>
    %c0_33 = arith.constant 0 : index
    %c0_34 = arith.constant 0 : index
    %27 = vector.load %arg4[%c0_33, %c0_34] : memref<384x384xf32, #tpu.memory_space<vmem>>, vector<384x384xf32>
    %cst_35 = arith.constant dense<0.000000e+00> : vector<32x384xf32>
    %28 = tpu.matmul %26, %27, %cst_35 {dimension_numbers = #tpu.dot_dimension_numbers<[1], [0], [0], [1], [0, 0, 1, 1], [], []>} : vector<32x384xf32>, vector<384x384xf32>, vector<32x384xf32> -> vector<32x384xf32>
    %c0_36 = arith.constant 0 : index
    %c0_37 = arith.constant 0 : index
    %29 = vector.load %arg5[%c0_36, %c0_37] : memref<1x384xf32, #tpu.memory_space<vmem>>, vector<1x384xf32>
    %30 = vector.broadcast %29 : vector<1x384xf32> to vector<32x384xf32>
    %31 = arith.addf %28, %30 : vector<32x384xf32>
    %c0_38 = arith.constant 0 : index
    %c0_39 = arith.constant 0 : index
    %32 = vector.load %arg6[%c0_38, %c0_39] : memref<32x384xf32, #tpu.memory_space<vmem>>, vector<32x384xf32>
    tpu.vector_store %arg6[%c0_38, %c0_39], %31 {strides = array<i32>} : memref<32x384xf32, #tpu.memory_space<vmem>>, vector<32x384xf32>,
    return
  }
  func.func @transform_0(%arg0: i32) -> (i32, i32, i32) {
    %c0_i32 = arith.constant 0 : i32
    %c0_i32_0 = arith.constant 0 : i32
    %c0_i32_1 = arith.constant 0 : i32
    %c0_i32_2 = arith.constant 0 : i32
    return %c0_i32, %c0_i32_0, %c0_i32_1 : i32, i32, i32
  }
  func.func @transform_1(%arg0: i32) -> (i32, i32) {
    %c0_i32 = arith.constant 0 : i32
    %c0_i32_0 = arith.constant 0 : i32
    %c0_i32_1 = arith.constant 0 : i32
    return %c0_i32, %c0_i32_0 : i32, i32
  }
  func.func @transform_2(%arg0: i32) -> (i32, i32) {
    %c0_i32 = arith.constant 0 : i32
    %c0_i32_0 = arith.constant 0 : i32
    %c0_i32_1 = arith.constant 0 : i32
    return %c0_i32, %c0_i32_0 : i32, i32
  }
  func.func @transform_3(%arg0: i32) -> (i32, i32) {
    %c0_i32 = arith.constant 0 : i32
    %c0_i32_0 = arith.constant 0 : i32
    %c0_i32_1 = arith.constant 0 : i32
    return %c0_i32, %c0_i32_0 : i32, i32
  }
  func.func @transform_4(%arg0: i32) -> (i32, i32) {
    %c0_i32 = arith.constant 0 : i32
    %c0_i32_0 = arith.constant 0 : i32
    %c0_i32_1 = arith.constant 0 : i32
    return %c0_i32, %c0_i32_0 : i32, i32
  }
  func.func @transform_5(%arg0: i32) -> (i32, i32) {
    %c0_i32 = arith.constant 0 : i32
    %c0_i32_0 = arith.constant 0 : i32
    %c0_i32_1 = arith.constant 0 : i32
    return %c0_i32, %c0_i32_0 : i32, i32
  }
}

</mosaic_0001>

<bundles_post_ra>
// kernel: two_sided_dilconv1d_forward.1
= control target key start
LH: loop header
LB: loop body
LE: loop exit
PB: predicated region body
PF: predicated region fallthrough
CT: control target
= control target key end

     0   :  { %10 = vsyncpa [#allocation5], 0  ;;  %s1583_s0 = inlined_call_operand.hbm [shape: f32[2,16,39], index: 0, kind: input, shape index: {}]   ;;  %s1584_s1 = inlined_call_operand.hbm [shape: f32[384,128], index: 1, kind: input, shape index: {}]   ;;  %s1585_s2 = inlined_call_operand.vmem [shape: f32[1,128], index: 2, kind: input, shape index: {}]   ;;  %s1586_s3 = inlined_call_operand.hbm [shape: f32[384,384], index: 3, kind: input, shape index: {}]   ;;  %s1587_s4 = inlined_call_operand.vmem [shape: f32[1,384], index: 4, kind: input, shape index: {}]   ;;  %s1588_s5 = inlined_call_operand.vmem [shape: f32[32,384], index: 5, kind: output, shape index: {}]  }
   0x1   :  { %11 = vsyncpa [#allocation7], 0  ;;  %s1405_s18 = smov [#allocation6]   ;;  %s1406_s20 = smov [#allocation4]  }
   0x2   :  { %s29_s19 = sshll.u32 %s1405_s18, 4  ;;  %s17_s21 = sshll.u32 %s1406_s20, 4  ;;  %s30_s19 = int_to_ptr.vmem [resolvable:$true] %s29_s19  ;;  %s1443_s21 = int_to_ptr.vmem [resolvable:$true] %s17_s21 }
   0x3   :  { %s1335_s24 = scalar_lea.hbm %s1584_s1, 6144 }
   0x4   :  { %p1336_p0 = scmp.ne.s32.totalorder %s1584_s1, %s1335_s24  ;;  %p1339_p1 = scmp.lt.u32.totalorder %s1335_s24, %s1584_s1 }
   0x6   :  { %p1341_p2 = pnand %p1339_p1, %p1336_p0 }
   0x8   :  { %1344 = shalt.err (!%p1341_p2)
}
   0x9   :  { %s1345_s29 = scalar_lea.vmem %s30_s19, 6144  ;;  %p1350_p4 = scmp.lt.s32.totalorder %s30_s19, %s30_s19 }
   0xa   :  { %p1346_p3 = scmp.ne.s32.totalorder %s30_s19, %s1345_s29  ;;  %p1351_p5 = scmp.lt.s32.totalorder %s1345_s29, %s1345_s29 }
   0xc   :  { %p1352_p6 = por %p1351_p5, %p1350_p4 }
   0xe   :  { %p1353_p7 = pnand %p1352_p6, %p1346_p3 }
  0x10   :  { %1356 = shalt.err (!%p1353_p7)
}
  0x11   :  { %s1407_s30 = smov 128   ;;  %s1408_s6 = smov 8  }
  0x12   :  { %35 = dma.hbm_to_vmem [thread:$0]  %s1584_s1, 6144, %s30_s19, [#allocation7], %s1407_s30, %s1407_s30, %s1408_s6  }
  0x13   :  { %s1357_s11 = scalar_lea.hbm %s1583_s0, 512 }
  0x14   :  { %p1358_p8 = scmp.ne.s32.totalorder %s1583_s0, %s1357_s11  ;;  %p1361_p9 = scmp.lt.u32.totalorder %s1357_s11, %s1583_s0 }
  0x16   :  { %p1363_p10 = pnand %p1361_p9, %p1358_p8 }
  0x18   :  { %1366 = shalt.err (!%p1363_p10)
}
  0x19   :  { %s1367_s16 = scalar_lea.vmem %s1443_s21, 512  ;;  %p1372_p12 = scmp.lt.s32.totalorder %s1443_s21, %s1443_s21 }
  0x1a   :  { %p1368_p11 = scmp.ne.s32.totalorder %s1443_s21, %s1367_s16  ;;  %p1373_p13 = scmp.lt.s32.totalorder %s1367_s16, %s1367_s16 }
  0x1c   :  { %p1374_p0 = por %p1373_p13, %p1372_p12 }
  0x1e   :  { %p1375_p1 = pnand %p1374_p0, %p1368_p11 }
  0x20   :  { %1378 = shalt.err (!%p1375_p1)
}
  0x21   :  { %23 = dma.hbm_to_vmem [thread:$0]  %s1583_s0, 512, %s1443_s21, [#allocation5], %s1407_s30, %s1407_s30, %s1408_s6  }
  0x22   :  { %s1409_s18 = smov [#allocation8]   ;;  %s1379_s23 = scalar_lea.hbm %s1586_s3, 18432 }
  0x23   :  { %s43_s19 = sshll.u32 %s1409_s18, 4  ;;  %p1380_p2 = scmp.ne.s32.totalorder %s1586_s3, %s1379_s23  ;;  %s44_s19 = int_to_ptr.vmem [resolvable:$true] %s43_s19 }
  0x24   :  { %p1383_p3 = scmp.lt.u32.totalorder %s1379_s23, %s1586_s3 }
  0x26   :  { %p1385_p4 = pnand %p1383_p3, %p1380_p2 }
  0x28   :  { %1388 = shalt.err (!%p1385_p4)
}
  0x29   :  { %s1389_s28 = scalar_lea.vmem %s44_s19, 18432  ;;  %p1394_p6 = scmp.lt.s32.totalorder %s44_s19, %s44_s19 }
  0x2a   :  { %p1390_p5 = scmp.ne.s32.totalorder %s44_s19, %s1389_s28  ;;  %p1395_p7 = scmp.lt.s32.totalorder %s1389_s28, %s1389_s28 }
  0x2c   :  { %p1396_p8 = por %p1395_p7, %p1394_p6 }
  0x2e   :  { %p1397_p9 = pnand %p1396_p8, %p1390_p5 }
  0x30   :  { %1400 = shalt.err (!%p1397_p9)
}
  0x31   :  { %s1410_s0 = smov 384   ;;  %s1411_s21 = smov 24  }
  0x32   :  { %49 = dma.hbm_to_vmem [thread:$0]  %s1586_s3, 18432, %s44_s19, [#allocation7], %s1410_s0, %s1410_s0, %s1411_s21  }
  0x33   :  { %1401 = dma.done.wait [#allocation5], 512  }
  0x34   :  { %1402 = vsyncadd [#allocation5], 4294966784 }
  0x35   :  { %1403 = dma.done.wait [#allocation7], 24576  }
  0x36   :  { %1404 = vsyncadd [#allocation7], 4294942720  ;;  %v1412_v0 = vmov 0.0   ;;  %v106_v1 = vld [vmem:[#allocation6 + $0x80] sm:$0xff]  ;;  %v107_v2 = vld [vmem:[#allocation6 + $0x88] sm:$0xff]  ;;  %vm73_vm0 = vcmask 318464  }
  0x37   :  { %62 = vst [vmem:[#allocation2 + $0x8] sm:$0xff] %v1412_v0  ;;  %61 = vst [vmem:[#allocation2] sm:$0xff] %v1412_v0  ;;  %v90_v3 = vld [vmem:[#allocation6] sm:$0xff]  ;;  %v1071_v4 = vpack.c.bf16 %v107_v2, %v106_v1  ;;  %v91_v5 = vld [vmem:[#allocation6 + $0x8] sm:$0xff] }
  0x38   :  { %63 = vst [vmem:[#allocation2 + $0x10] sm:$0xff] %v1412_v0  ;;  %64 = vst [vmem:[#allocation2 + $0x18] sm:$0x1] %v1412_v0  ;;  %v108_v6 = vld [vmem:[#allocation6 + $0x90] sm:$0xff]  ;;  %v109_v7 = vld [vmem:[#allocation6 + $0x98] sm:$0xff]  ;;  %v1073_v8 = vpack.c.bf16 %v91_v5, %v90_v3 }
  0x39   :  { %65 = vst [vmem:[#allocation2 + $0x20] sm:$0xff] %v1412_v0  ;;  %66 = vst [vmem:[#allocation2 + $0x28] sm:$0xff] %v1412_v0  ;;  %v1075_v9 = vpack.c.bf16 %v109_v7, %v108_v6  ;;  %v92_v10 = vld [vmem:[#allocation6 + $0x10] sm:$0xff]  ;;  %v93_v11 = vld [vmem:[#allocation6 + $0x18] sm:$0xff]  ;;  %1072 = vmatprep.subr.bf16.mxu1 %v1071_v4 }
  0x3a   :  { %67 = vst [vmem:[#allocation2 + $0x30] sm:$0xff] %v1412_v0  ;;  %68 = vst [vmem:[#allocation2 + $0x38] sm:$0x1] %v1412_v0  ;;  %v110_v12 = vld [vmem:[#allocation6 + $0xa0] sm:$0xff]  ;;  %v111_v13 = vld [vmem:[#allocation6 + $0xa8] sm:$0xff]  ;;  %1074 = vmatpush3.bf16.msra.mxu1 %v1073_v8  ;;  %v1077_v14 = vpack.c.bf16 %v93_v11, %v92_v10 }
  0x3b   :  { %315 = vst [vmem:[#allocation3] sm:$0xff] %v1412_v0  ;;  %318 = vst [vmem:[#allocation3 + $0x18] sm:$0x7] %v1412_v0  ;;  %1076 = vmatprep.subr.bf16.mxu1 %v1075_v9  ;;  %v1079_v15 = vpack.c.bf16 %v111_v13, %v110_v12  ;;  %v94_v16 = vld [vmem:[#allocation6 + $0x20] sm:$0xff]  ;;  %v95_v17 = vld [vmem:[#allocation6 + $0x28] sm:$0xff] }
  0x3c   :  { %319 = vst [vmem:[#allocation3 + $0x20] sm:$0xff] %v1412_v0  ;;  %322 = vst [vmem:[#allocation3 + $0x38] sm:$0x7] %v1412_v0  ;;  %v112_v18 = vld [vmem:[#allocation6 + $0xb0] sm:$0xff]  ;;  %v113_v19 = vld [vmem:[#allocation6 + $0xb8] sm:$0xff]  ;;  %v1081_v20 = vpack.c.bf16 %v95_v17, %v94_v16 }
  0x3d   :  { %v1083_v21 = vpack.c.bf16 %v113_v19, %v112_v18  ;;  %v96_v22 = vld [vmem:[#allocation6 + $0x30] sm:$0xff]  ;;  %v97_v23 = vld [vmem:[#allocation6 + $0x38] sm:$0xff]  ;;  %v114_v24 = vld [vmem:[#allocation6 + $0xc0] sm:$0xff] }
  0x3e   :  { %1078 = vmatpush3.bf16.msra.mxu1 %v1077_v14  ;;  %v115_v25 = vld [vmem:[#allocation6 + $0xc8] sm:$0xff]  ;;  %v69_v26 = vld [vmem:[#allocation4] sm:$0xff]  ;;  %v1085_v27 = vpack.c.bf16 %v97_v23, %v96_v22  ;;  %v116_v31 = vld [vmem:[#allocation6 + $0xd0] sm:$0xff] }
  0x3f   :  { %1080 = vmatprep.subr.bf16.mxu1 %v1079_v15  ;;  %74 = vst.msk [vmem:[#allocation2 + $0x8] sm:$0xff] %vm73_vm0, %v69_v26  ;;  %v1087_v28 = vpack.c.bf16 %v115_v25, %v114_v24  ;;  %v98_v29 = vld [vmem:[#allocation6 + $0x40] sm:$0xff]  ;;  %v99_v30 = vld [vmem:[#allocation6 + $0x48] sm:$0xff]  ;;  %v117_v32 = vld [vmem:[#allocation6 + $0xd8] sm:$0xff] }
  0x40   :  { %v70_v33 = vld [vmem:[#allocation4 + $0x8] sm:$0xff]  ;;  %v71_v34 = vld [vmem:[#allocation4 + $0x10] sm:$0xff]  ;;  %v1089_v35 = vpack.c.bf16 %v99_v30, %v98_v29  ;;  %v101_v37 = vld [vmem:[#allocation6 + $0x58] sm:$0xff]  ;;  %v1091_v39 = vpack.c.bf16 %v117_v32, %v116_v31 }
  0x41   :  { %75 = vst.msk [vmem:[#allocation2 + $0x10] sm:$0xff] %vm73_vm0, %v70_v33  ;;  %v100_v36 = vld [vmem:[#allocation6 + $0x50] sm:$0xff]  ;;  %76 = vst.msk [vmem:[#allocation2 + $0x28] sm:$0xff] %vm73_vm0, %v71_v34  ;;  %v72_v38 = vld [vmem:[#allocation4 + $0x18] sm:$0xff] }
  0x42   :  { %1082 = vmatpush3.bf16.msra.mxu1 %v1081_v20  ;;  %v118_v40 = vld [vmem:[#allocation6 + $0xe0] sm:$0xff]  ;;  %77 = vst.msk [vmem:[#allocation2 + $0x30] sm:$0xff] %vm73_vm0, %v72_v38  ;;  %v340_v41 = vld [vmem:[#allocation8 + $0x8] sm:$0xff]  ;;  %v342_v47 = vld [vmem:[#allocation8 + $0x18] sm:$0xff]  ;;  %v1093_v50 = vpack.c.bf16 %v101_v37, %v100_v36 }
  0x43   :  { %1084 = vmatprep.subr.bf16.mxu1 %v1083_v21  ;;  %v343_v42 = vld [vmem:[#allocation8 + $0x20] sm:$0xff]  ;;  %v119_v43 = vld [vmem:[#allocation6 + $0xe8] sm:$0xff]  ;;  %v346_v48 = vld [vmem:[#allocation8 + $0x38] sm:$0xff] }
  0x44   :  { %v1135_v45 = vpack.c.bf16 %v343_v42, %v340_v41  ;;  %v339_v46 = vld [vmem:[#allocation8] sm:$0xff]  ;;  %v349_v49 = vld [vmem:[#allocation8 + $0x50] sm:$0xff]  ;;  %v348_v54 = vld [vmem:[#allocation8 + $0x48] sm:$0xff]  ;;  %v1095_v56 = vpack.c.bf16 %v119_v43, %v118_v40 }
  0x45   :  { %v1137_v51 = vpack.c.bf16 %v342_v47, %v339_v46  ;;  %v1139_v52 = vpack.c.bf16 %v349_v49, %v346_v48  ;;  %v345_v53 = vld [vmem:[#allocation8 + $0x30] sm:$0xff]  ;;  %v352_v55 = vld [vmem:[#allocation8 + $0x68] sm:$0xff]  ;;  %v102_v57 = vld [vmem:[#allocation6 + $0x60] sm:$0xff] }
  0x46   :  { %1086 = vmatpush3.bf16.msra.mxu1 %v1085_v27  ;;  %v82_v44 = vld [vmem:[#allocation2 + $0x8] sm:$0xff]  ;;  %1136 = vmatprep.subr.bf16.mxu0 %v1135_v45  ;;  %v355_v59 = vld [vmem:[#allocation8 + $0x80] sm:$0xff]  ;;  %v120_v60 = vld [vmem:[#allocation6 + $0xf0] sm:$0xff]  ;;  %v1141_v62 = vpack.c.bf16 %v348_v54, %v345_v53 }
  0x47   :  { %1088 = vmatprep.subr.bf16.mxu1 %v1087_v28  ;;  %209 = vmatprep.mubr.f32.mxu1 %v82_v44  ;;  %v103_v58 = vld [vmem:[#allocation6 + $0x68] sm:$0xff]  ;;  %v121_v61 = vld [vmem:[#allocation6 + $0xf8] sm:$0xff]  ;;  %v1143_v63 = vpack.c.bf16 %v355_v59, %v352_v55  ;;  %v351_v1 = vld [vmem:[#allocation8 + $0x60] sm:$0xff] }
  0x48   :  { %1138 = vmatpush1.bf16.msra.mxu0 %v1137_v51  ;;  %v354_v2 = vld [vmem:[#allocation8 + $0x78] sm:$0xff]  ;;  %v1097_v3 = vpack.c.bf16 %v103_v58, %v102_v57  ;;  %v104_v4 = vld [vmem:[#allocation6 + $0x70] sm:$0xff]  ;;  %v1099_v5 = vpack.c.bf16 %v121_v61, %v120_v60  ;;  %v122_v9 = vld [vmem:[#allocation6 + $0x100] sm:$0xff] }
  0x49   :  { %1140 = vmatprep.subr.bf16.mxu0 %v1139_v52  ;;  %v105_v6 = vld [vmem:[#allocation6 + $0x78] sm:$0xff]  ;;  %v361_v8 = vld [vmem:[#allocation8 + $0xb0] sm:$0xff]  ;;  %v123_v10 = vld [vmem:[#allocation6 + $0x108] sm:$0xff]  ;;  %v1145_v11 = vpack.c.bf16 %v354_v2, %v351_v1 }
  0x4a   :  { %1090 = vmatpush3.bf16.msra.mxu1 %v1089_v35  ;;  %v358_v7 = vld [vmem:[#allocation8 + $0x98] sm:$0xff]  ;;  %v357_v13 = vld [vmem:[#allocation8 + $0x90] sm:$0xff]  ;;  %v360_v14 = vld [vmem:[#allocation8 + $0xa8] sm:$0xff]  ;;  %v1101_v15 = vpack.c.bf16 %v105_v6, %v104_v4  ;;  %v1103_v18 = vpack.c.bf16 %v123_v10, %v122_v9 }
  0x4b   :  { %1092 = vmatprep.subr.bf16.mxu1 %v1091_v39  ;;  %v1147_v12 = vpack.c.bf16 %v361_v8, %v358_v7  ;;  %v364_v16 = vld [vmem:[#allocation8 + $0xc8] sm:$0xff]  ;;  %v367_v17 = vld [vmem:[#allocation8 + $0xe0] sm:$0xff]  ;;  %v124_v19 = vld [vmem:[#allocation6 + $0x110] sm:$0xff]  ;;  %v1149_v21 = vpack.c.bf16 %v360_v14, %v357_v13 }
  0x4c   :  { %1142 = vmatpush1.bf16.msra.mxu0 %v1141_v62  ;;  %v125_v20 = vld [vmem:[#allocation6 + $0x118] sm:$0xff]  ;;  %v1151_v22 = vpack.c.bf16 %v367_v17, %v364_v16  ;;  %v363_v23 = vld [vmem:[#allocation8 + $0xc0] sm:$0xff]  ;;  %v83_v27 = vld [vmem:[#allocation2 + $0x10] sm:$0xff] }
  0x4d   :  { %1144 = vmatprep.subr.bf16.mxu0 %v1143_v63  ;;  %v366_v24 = vld [vmem:[#allocation8 + $0xd8] sm:$0xff]  ;;  %v78_v25 = vld [vmem:[#allocation2 + $0x7] sm:$0xff]  ;;  %v1107_v26 = vpack.c.bf16 %v125_v20, %v124_v19  ;;  %v79_v31 = vld [vmem:[#allocation2 + $0xf] sm:$0xff] }
  0x4e   :  { %1094 = vmatpush3.bf16.msra.mxu1 %v1093_v50  ;;  %v126_v28 = vld [vmem:[#allocation6 + $0x120] sm:$0xff]  ;;  %v127_v29 = vld [vmem:[#allocation6 + $0x128] sm:$0xff]  ;;  %v1153_v30 = vpack.c.bf16 %v366_v24, %v363_v23  ;;  %v128_v34 = vld [vmem:[#allocation6 + $0x130] sm:$0xff] }
  0x4f   :  { %1096 = vmatprep.subr.bf16.mxu1 %v1095_v56  ;;  %v1111_v32 = vpack.c.bf16 %v127_v29, %v126_v28  ;;  %v84_v33 = vld [vmem:[#allocation2 + $0x28] sm:$0xff]  ;;  %v129_v35 = vld [vmem:[#allocation6 + $0x138] sm:$0xff]  ;;  %v85_v38 = vld [vmem:[#allocation2 + $0x30] sm:$0xff] }
  0x50   :  { %1146 = vmatpush1.bf16.msra.mxu0 %v1145_v11  ;;  %v80_v36 = vld [vmem:[#allocation2 + $0x27] sm:$0xff]  ;;  %v1115_v37 = vpack.c.bf16 %v129_v35, %v128_v34  ;;  %v81_v41 = vld [vmem:[#allocation2 + $0x2f] sm:$0xff]  ;;  %v133_v45 = vld [vmem:[#allocation6 + $0x158] sm:$0xff] }
  0x51   :  { %1148 = vmatprep.subr.bf16.mxu0 %v1147_v12  ;;  %v130_v39 = vld [vmem:[#allocation6 + $0x140] sm:$0xff]  ;;  %v131_v40 = vld [vmem:[#allocation6 + $0x148] sm:$0xff]  ;;  %v132_v44 = vld [vmem:[#allocation6 + $0x150] sm:$0xff] }
  0x52   :  { %1098 = vmatpush3.bf16.msra.mxu1 %v1097_v3  ;;  %v1119_v42 = vpack.c.bf16 %v131_v40, %v130_v39  ;;  %v86_v43 = vld [vmem:[#allocation2 + $0x9] sm:$0xff]  ;;  %v1123_v46 = vpack.c.bf16 %v133_v45, %v132_v44  ;;  %v134_v47 = vld [vmem:[#allocation6 + $0x160] sm:$0xff]  ;;  %v137_v51 = vld [vmem:[#allocation6 + $0x178] sm:$0xff] }
  0x53   :  { %1100 = vmatprep.subr.bf16.mxu1 %v1099_v5  ;;  %v135_v48 = vld [vmem:[#allocation6 + $0x168] sm:$0xff]  ;;  %v136_v50 = vld [vmem:[#allocation6 + $0x170] sm:$0xff]  ;;  %v370_v56 = vld [vmem:[#allocation8 + $0xf8] sm:$0xff] }
  0x54   :  { %1150 = vmatpush1.bf16.msra.mxu0 %v1149_v21  ;;  %v1127_v49 = vpack.c.bf16 %v135_v48, %v134_v47  ;;  %v1131_v52 = vpack.c.bf16 %v137_v51, %v136_v50  ;;  %v87_v53 = vld [vmem:[#allocation2 + $0x11] sm:$0xff]  ;;  %v88_v54 = vld [vmem:[#allocation2 + $0x29] sm:$0xff]  ;;  %v379_v63 = vld [vmem:[#allocation8 + $0x140] sm:$0xff] }
  0x55   :  { %1152 = vmatprep.subr.bf16.mxu0 %v1151_v22  ;;  %v89_v55 = vld [vmem:[#allocation2 + $0x31] sm:$0xff]  ;;  %v372_v60 = vld [vmem:[#allocation8 + $0x108] sm:$0xff]  ;;  %v375_v2 = vld [vmem:[#allocation8 + $0x120] sm:$0xff] }
  0x56   :  { %1102 = vmatpush3.bf16.msra.mxu1 %v1101_v15  ;;  %v373_v57 = vld [vmem:[#allocation8 + $0x110] sm:$0xff]  ;;  %v376_v62 = vld [vmem:[#allocation8 + $0x128] sm:$0xff]  ;;  %v378_v3 = vld [vmem:[#allocation8 + $0x138] sm:$0xff] }
  0x57   :  { %1104 = vmatprep.subr.bf16.mxu1 %v1103_v18  ;;  %v1155_v58 = vpack.c.bf16 %v373_v57, %v370_v56  ;;  %v369_v59 = vld [vmem:[#allocation8 + $0xf0] sm:$0xff]  ;;  %v1159_v1 = vpack.c.bf16 %v379_v63, %v376_v62  ;;  %v1161_v4 = vpack.c.bf16 %v378_v3, %v375_v2  ;;  %v382_v5 = vld [vmem:[#allocation8 + $0x158] sm:$0xff]  ;;  %v384_v9 = vld [vmem:[#allocation8 + $0x168] sm:$0xff] }
  0x58   :  { %1154 = vmatpush1.bf16.msra.mxu0 %v1153_v30  ;;  %v1157_v61 = vpack.c.bf16 %v372_v60, %v369_v59  ;;  %v385_v6 = vld [vmem:[#allocation8 + $0x170] sm:$0xff]  ;;  %v388_v10 = vld [vmem:[#allocation8 + $0x188] sm:$0xff]  ;;  %v391_v11 = vld [vmem:[#allocation8 + $0x1a0] sm:$0xff] }
  0x59   :  { %210 = vmatmul.mubr.f32.vlgmr.msra.gmra.mrb[0].mxu1 %v78_v25  ;;  %1156 = vmatprep.subr.bf16.mxu0 %v1155_v58  ;;  %v381_v7 = vld [vmem:[#allocation8 + $0x150] sm:$0xff]  ;;  %v1163_v8 = vpack.c.bf16 %v385_v6, %v382_v5  ;;  %v392_v14 = vld [vmem:[#allocation8 + $0x1a8] sm:$0xff]  ;;  %v387_v15 = vld [vmem:[#allocation8 + $0x180] sm:$0xff]  ;;  %v1167_v16 = vpack.c.bf16 %v391_v11, %v388_v10 }
  0x5a   :  { %1106 = vmatpush3.bf16.msra.mxu1 %v1103_v18  ;;  %214 = vmatprep.mubr.f32.mxu1 %v83_v27  ;;  %v1165_v12 = vpack.c.bf16 %v384_v9, %v381_v7  ;;  %v389_v13 = vld [vmem:[#allocation8 + $0x190] sm:$0xff]  ;;  %v390_v18 = vld [vmem:[#allocation8 + $0x198] sm:$0xff]  ;;  %v344_v20 = vld [vmem:[#allocation8 + $0x28] sm:$0xff] }
  0x5b   :  { %1108 = vmatprep.subr.bf16.mxu1 %v1107_v26  ;;  %v1231_v17 = vpack.c.bf16 %v392_v14, %v389_v13  ;;  %v341_v19 = vld [vmem:[#allocation8 + $0x10] sm:$0xff]  ;;  %v394_v22 = vld [vmem:[#allocation8 + $0x1b8] sm:$0xff]  ;;  %v395_v24 = vld [vmem:[#allocation8 + $0x1c0] sm:$0xff] }
  0x5c   :  { %1158 = vmatpush1.bf16.msra.mxu0 %v1157_v61  ;;  %v1233_v21 = vpack.c.bf16 %v344_v20, %v341_v19  ;;  %v397_v23 = vld [vmem:[#allocation8 + $0x1d0] sm:$0xff]  ;;  %v398_v25 = vld [vmem:[#allocation8 + $0x1d8] sm:$0xff]  ;;  %v347_v29 = vld [vmem:[#allocation8 + $0x40] sm:$0xff] }
  0x5d   :  { %215 = vmatmul.mubr.f32.gmra.mrb[2].mxu1 %v79_v31  ;;  %1160 = vmatprep.subr.bf16.mxu0 %v1159_v1  ;;  %v1235_v27 = vpack.c.bf16 %v398_v25, %v395_v24  ;;  %v393_v28 = vld [vmem:[#allocation8 + $0x1b0] sm:$0xff]  ;;  %v350_v30 = vld [vmem:[#allocation8 + $0x58] sm:$0xff]  ;;  %v1171_v31 = vpack.c.bf16 %v397_v23, %v394_v22  ;;  %v404_v35 = vld [vmem:[#allocation8 + $0x208] sm:$0xff] }
  0x5e   :  { %1110 = vmatpush3.bf16.msra.mxu1 %v1107_v26  ;;  %219 = vmatprep.mubr.f32.mxu1 %v84_v33  ;;  %v1169_v26 = vpack.c.bf16 %v390_v18, %v387_v15  ;;  %v1237_v33 = vpack.c.bf16 %v350_v30, %v347_v29  ;;  %v401_v34 = vld [vmem:[#allocation8 + $0x1f0] sm:$0xff]  ;;  %v356_v40 = vld [vmem:[#allocation8 + $0x88] sm:$0xff]  ;;  %v407_v44 = vld [vmem:[#allocation8 + $0x220] sm:$0xff] }
  0x5f   :  { %1112 = vmatprep.subr.bf16.mxu1 %v1111_v32  ;;  %v353_v39 = vld [vmem:[#allocation8 + $0x70] sm:$0xff]  ;;  %v410_v45 = vld [vmem:[#allocation8 + $0x238] sm:$0xff]  ;;  %v408_v59 = vld [vmem:[#allocation8 + $0x228] sm:$0xff] }
  0x60   :  { %1162 = vmatpush1.bf16.msra.mxu0 %v1161_v4  ;;  %v402_v47 = vld [vmem:[#allocation8 + $0x1f8] sm:$0xff]  ;;  %v1243_v48 = vpack.c.bf16 %v410_v45, %v407_v44  ;;  %v405_v56 = vld [vmem:[#allocation8 + $0x210] sm:$0xff]  ;;  %v368_v62 = vld [vmem:[#allocation8 + $0xe8] sm:$0xff] }
  0x61   :  { %220 = vmatmul.mubr.f32.gmra.mrb[4].mxu1 %v80_v36  ;;  %1164 = vmatprep.subr.bf16.mxu0 %v1163_v8  ;;  %v400_v36 = vld [vmem:[#allocation8 + $0x1e8] sm:$0xff]  ;;  %v362_v50 = vld [vmem:[#allocation8 + $0xb8] sm:$0xff]  ;;  %v365_v61 = vld [vmem:[#allocation8 + $0xd0] sm:$0xff]  ;;  %v1181_v2 = vpack.c.bf16 %v408_v59, %v405_v56 }
  0x62   :  { %1114 = vmatpush3.bf16.msra.mxu1 %v1111_v32  ;;  %224 = vmatprep.mubr.f32.mxu1 %v85_v38  ;;  %v396_v32 = vld [vmem:[#allocation8 + $0x1c8] sm:$0xff]  ;;  %v1239_v38 = vpack.c.bf16 %v404_v35, %v401_v34  ;;  %v406_v51 = vld [vmem:[#allocation8 + $0x218] sm:$0xff]  ;;  %v415_v1 = vld [vmem:[#allocation8 + $0x260] sm:$0xff]  ;;  %v1249_v3 = vpack.c.bf16 %v368_v62, %v365_v61 }
  0x63   :  { %1116 = vmatprep.subr.bf16.mxu1 %v1115_v37  ;;  %v412_v63 = vld [vmem:[#allocation8 + $0x248] sm:$0xff]  ;;  %v411_v5 = vld [vmem:[#allocation8 + $0x240] sm:$0xff]  ;;  %v414_v6 = vld [vmem:[#allocation8 + $0x258] sm:$0xff] }
  0x64   :  { %1166 = vmatpush1.bf16.msra.mxu0 %v1165_v12  ;;  %v1183_v4 = vpack.c.bf16 %v415_v1, %v412_v63  ;;  %v1185_v7 = vpack.c.bf16 %v414_v6, %v411_v5  ;;  %v418_v8 = vld [vmem:[#allocation8 + $0x278] sm:$0xff]  ;;  %v421_v9 = vld [vmem:[#allocation8 + $0x290] sm:$0xff]  ;;  %v419_v10 = vld [vmem:[#allocation8 + $0x280] sm:$0xff] }
  0x65   :  { %225 = vmatmul.mubr.f32.gmra.mrb[6].mxu1 %v81_v41  ;;  %1168 = vmatprep.subr.bf16.mxu0 %v1167_v16  ;;  %v1173_v41 = vpack.c.bf16 %v396_v32, %v393_v28  ;;  %v1187_v11 = vpack.c.bf16 %v421_v9, %v418_v8  ;;  %v422_v12 = vld [vmem:[#allocation8 + $0x298] sm:$0xff]  ;;  %v417_v13 = vld [vmem:[#allocation8 + $0x270] sm:$0xff]  ;;  %v420_v14 = vld [vmem:[#allocation8 + $0x288] sm:$0xff] }
  0x66   :  { %1118 = vmatpush3.bf16.msra.mxu1 %v1115_v37  ;;  %1027 = vmatprep.mubr.f32.mxu1 %v86_v43  ;;  %v403_v37 = vld [vmem:[#allocation8 + $0x200] sm:$0xff]  ;;  %v1241_v43 = vpack.c.bf16 %v356_v40, %v353_v39  ;;  %v1251_v15 = vpack.c.bf16 %v422_v12, %v419_v10  ;;  %v1189_v16 = vpack.c.bf16 %v420_v14, %v417_v13  ;;  %v374_v18 = vld [vmem:[#allocation8 + $0x118] sm:$0xff]  ;;  %v424_v20 = vld [vmem:[#allocation8 + $0x2a8] sm:$0xff] }
  0x67   :  { %1120 = vmatprep.subr.bf16.mxu1 %v1119_v42  ;;  %v425_v22 = vld [vmem:[#allocation8 + $0x2b0] sm:$0xff]  ;;  %v428_v24 = vld [vmem:[#allocation8 + $0x2c8] sm:$0xff]  ;;  %v423_v25 = vld [vmem:[#allocation8 + $0x2a0] sm:$0xff] }
  0x68   :  { %1170 = vmatpush1.bf16.msra.mxu0 %v1169_v26  ;;  %v426_v26 = vld [vmem:[#allocation8 + $0x2b8] sm:$0xff]  ;;  %v377_v29 = vld [vmem:[#allocation8 + $0x130] sm:$0xff]  ;;  %v380_v30 = vld [vmem:[#allocation8 + $0x148] sm:$0xff] }
  0x69   :  { %1172 = vmatprep.subr.bf16.mxu0 %v1171_v31  ;;  %v1193_v28 = vpack.c.bf16 %v426_v26, %v423_v25  ;;  %v1257_v31 = vpack.c.bf16 %v380_v30, %v377_v29  ;;  %v430_v32 = vld [vmem:[#allocation8 + $0x2d8] sm:$0xff]  ;;  %v431_v34 = vld [vmem:[#allocation8 + $0x2e0] sm:$0xff]  ;;  %v436_v44 = vld [vmem:[#allocation8 + $0x308] sm:$0xff] }
  0x6a   :  { %1122 = vmatpush3.bf16.msra.mxu1 %v1119_v42  ;;  %v399_v42 = vld [vmem:[#allocation8 + $0x1e0] sm:$0xff]  ;;  %v438_v13 = vld [vmem:[#allocation8 + $0x318] sm:$0xff]  ;;  %v449_v26 = vld [vmem:[#allocation8 + $0x370] sm:$0xff] }
  0x6b   :  { %1124 = vmatprep.subr.bf16.mxu1 %v1123_v46  ;;  %v439_v45 = vld [vmem:[#allocation8 + $0x320] sm:$0xff]  ;;  %v442_v14 = vld [vmem:[#allocation8 + $0x338] sm:$0xff] }
  0x6c   :  { %1174 = vmatpush1.bf16.msra.mxu0 %v1173_v41  ;;  %v383_v41 = vld [vmem:[#allocation8 + $0x160] sm:$0xff]  ;;  %v450_v30 = vld [vmem:[#allocation8 + $0x378] sm:$0xff] }
  0x6d   :  { %v866_v62 = vld [vmem:[%s1585_s2] ss:$0 sm:$0xff] }
  0x6e   :  { %1126 = vmatpush3.bf16.msra.mxu1 %v1123_v46  ;;  %v1175_v46 = vpack.c.bf16 %v403_v37, %v400_v36  ;;  %v434_v36 = vld [vmem:[#allocation8 + $0x2f8] sm:$0xff]  ;;  %v429_v37 = vld [vmem:[#allocation8 + $0x2d0] sm:$0xff]  ;;  %v435_v12 = vld [vmem:[#allocation8 + $0x300] sm:$0xff] }
  0x6f   :  { %1128 = vmatprep.subr.bf16.mxu1 %v1127_v49  ;;  %v1259_v39 = vpack.c.bf16 %v434_v36, %v431_v34  ;;  %v451_v25 = vld [vmem:[#allocation8 + $0x380] sm:$0xff]  ;;  %v454_v34 = vld [vmem:[#allocation8 + $0x398] sm:$0xff] }
  0x70   :  { %1176 = vmatprep.subr.bf16.mxu0 %v1175_v46  ;;  %v437_v46 = vld [vmem:[#allocation8 + $0x310] sm:$0xff]  ;;  %v447_v29 = vld [vmem:[#allocation8 + $0x360] sm:$0xff] }
  0x71   :  { %v455_v36 = vld [vmem:[#allocation8 + $0x3a0] sm:$0xff] }
  0x72   :  { %1130 = vmatpush3.bf16.msra.mxu1 %v1127_v49  ;;  %v359_v49 = vld [vmem:[#allocation8 + $0xa0] sm:$0xff] }
  0x73   :  { %1132 = vmatprep.subr.bf16.mxu1 %v1131_v52  ;;  %v1245_v57 = vpack.c.bf16 %v362_v50, %v359_v49 }
  0x76   :  { %1134 = vmatpush3.bf16.msra.mxu1 %v1131_v52  ;;  %v409_v52 = vld [vmem:[#allocation8 + $0x230] sm:$0xff] }
  0x77   :  { %1232 = vmatprep.subr.bf16.mxu1 %v1231_v17  ;;  %v1179_v58 = vpack.c.bf16 %v409_v52, %v406_v51  ;;  %v371_v17 = vld [vmem:[#allocation8 + $0x100] sm:$0xff] }
  0x78   :  { %v1253_v19 = vpack.c.bf16 %v374_v18, %v371_v17  ;;  %v446_v17 = vld [vmem:[#allocation8 + $0x358] sm:$0xff]  ;;  %v1201_v18 = vpack.c.bf16 %v438_v13, %v435_v12  ;;  %v481_v12 = vld [vmem:[#allocation8 + $0x470] sm:$0xff]  ;;  %v479_v13 = vld [vmem:[#allocation8 + $0x460] sm:$0xff] }
  0x79   :  { %1028 = vmatmul.mubr.f32.vlgmr.msra.gmra.mrb[8].mxu1 %v87_v53  ;;  %v413_v53 = vld [vmem:[#allocation8 + $0x250] sm:$0xff] }
  0x7a   :  { %1030 = vmatprep.mubr.f32.mxu1 %v88_v54  ;;  %1234 = vmatpush3.bf16.msra.mxu1 %v1233_v21  ;;  %v416_v54 = vld [vmem:[#allocation8 + $0x268] sm:$0xff]  ;;  %v427_v21 = vld [vmem:[#allocation8 + $0x2c0] sm:$0xff] }
  0x7b   :  { %1236 = vmatprep.subr.bf16.mxu1 %v1235_v27  ;;  %v1247_v60 = vpack.c.bf16 %v416_v54, %v413_v53  ;;  %v1191_v23 = vpack.c.bf16 %v427_v21, %v424_v20  ;;  %v1255_v27 = vpack.c.bf16 %v428_v24, %v425_v22  ;;  %v444_v20 = vld [vmem:[#allocation8 + $0x348] sm:$0xff] }
  0x7c   :  { %v448_v24 = vld [vmem:[#allocation8 + $0x368] sm:$0xff] }
  0x7d   :  { %1031 = vmatmul.mubr.f32.gmra.mrb[10].mxu1 %v89_v55  ;;  %v1177_v55 = vpack.c.bf16 %v402_v47, %v399_v42  ;;  %v386_v42 = vld [vmem:[#allocation8 + $0x178] sm:$0xff]  ;;  %v1199_v47 = vpack.c.bf16 %v439_v45, %v436_v44  ;;  %v460_v44 = vld [vmem:[#allocation8 + $0x3c8] sm:$0xff]  ;;  %v463_v45 = vld [vmem:[#allocation8 + $0x3e0] sm:$0xff] }
  0x7e   :  { %1238 = vmatpush3.bf16.msra.mxu1 %v1237_v33  ;;  %v433_v33 = vld [vmem:[#allocation8 + $0x2f0] sm:$0xff] }
  0x7f   :  { %1240 = vmatprep.subr.bf16.mxu1 %v1239_v38  ;;  %1178 = vmatpush1.bf16.msra.mxu0 %v1177_v55  ;;  %v1195_v35 = vpack.c.bf16 %v433_v33, %v430_v32  ;;  %v432_v38 = vld [vmem:[#allocation8 + $0x2e8] sm:$0xff]  ;;  %v1207_v32 = vpack.c.bf16 %v451_v25, %v448_v24 }
  0x80   :  { %1180 = vmatprep.subr.bf16.mxu0 %v1179_v58  ;;  %v1197_v40 = vpack.c.bf16 %v432_v38, %v429_v37  ;;  %v458_v37 = vld [vmem:[#allocation8 + $0x3b8] sm:$0xff]  ;;  %v1209_v38 = vpack.c.bf16 %v450_v30, %v447_v29 }
  0x82   :  { %1242 = vmatpush3.bf16.msra.mxu1 %v1241_v43  ;;  %v1261_v43 = vpack.c.bf16 %v386_v42, %v383_v41 }
  0x83   :  { %1244 = vmatprep.subr.bf16.mxu1 %v1243_v48  ;;  %1182 = vmatpush1.bf16.msra.mxu0 %v1181_v2  ;;  %v440_v48 = vld [vmem:[#allocation8 + $0x328] sm:$0xff] }
  0x84   :  { %1184 = vmatprep.subr.bf16.mxu0 %v1183_v4  ;;  %v1502_v49 = vpack.c.bf16 %v440_v48, %v437_v46  ;;  %v461_v46 = vld [vmem:[#allocation8 + $0x3d0] sm:$0xff] }
  0x86   :  { %1246 = vmatpush3.bf16.msra.mxu1 %v1245_v57 }
  0x87   :  { %1248 = vmatprep.subr.bf16.mxu1 %v1247_v60  ;;  %1186 = vmatpush1.bf16.msra.mxu0 %v1185_v7 }
  0x88   :  { %1188 = vmatprep.subr.bf16.mxu0 %v1187_v11 }
  0x8a   :  { %1250 = vmatpush3.bf16.msra.mxu1 %v1249_v3 }
  0x8b   :  { %1252 = vmatprep.subr.bf16.mxu1 %v1251_v15  ;;  %1190 = vmatpush1.bf16.msra.mxu0 %v1189_v16  ;;  %v445_v15 = vld [vmem:[#allocation8 + $0x350] sm:$0xff]  ;;  %v443_v16 = vld [vmem:[#allocation8 + $0x340] sm:$0xff] }
  0x8c   :  { %1192 = vmatprep.subr.bf16.mxu0 %v1191_v23  ;;  %v1203_v22 = vpack.c.bf16 %v445_v15, %v442_v14  ;;  %v1511_v23 = vpack.c.bf16 %v446_v17, %v443_v16  ;;  %v482_v14 = vld [vmem:[#allocation8 + $0x478] sm:$0xff] }
  0x8d   :  { %v1291_v17 = vpack.c.bf16 %v482_v14, %v479_v13 }
  0x8e   :  { %1254 = vmatpush3.bf16.msra.mxu1 %v1253_v19  ;;  %v441_v19 = vld [vmem:[#allocation8 + $0x330] sm:$0xff] }
  0x8f   :  { %1256 = vmatprep.subr.bf16.mxu1 %v1255_v27  ;;  %1194 = vmatpush1.bf16.msra.mxu0 %v1193_v28  ;;  %v452_v27 = vld [vmem:[#allocation8 + $0x388] sm:$0xff]  ;;  %v1205_v28 = vpack.c.bf16 %v444_v20, %v441_v19 }
  0x90   :  { %1196 = vmatprep.subr.bf16.mxu0 %v1195_v35  ;;  %v1515_v33 = vpack.c.bf16 %v452_v27, %v449_v26  ;;  %v457_v35 = vld [vmem:[#allocation8 + $0x3b0] sm:$0xff]  ;;  %v480_v19 = vld [vmem:[#allocation8 + $0x468] sm:$0xff] }
  0x91   :  { %v1211_v42 = vpack.c.bf16 %v457_v35, %v454_v34  ;;  %v485_v34 = vlaneseq }
  0x92   :  { %1258 = vmatpush3.bf16.msra.mxu1 %v1257_v31 }
  0x93   :  { %1260 = vmatprep.subr.bf16.mxu1 %v1259_v39  ;;  %1198 = vmatpush1.bf16.msra.mxu0 %v1197_v40  ;;  %v453_v39 = vld [vmem:[#allocation8 + $0x390] sm:$0xff]  ;;  %v456_v40 = vld [vmem:[#allocation8 + $0x3a8] sm:$0xff]  ;;  %v486_v35 = vshrl.u32 %v485_v34, 7 }
  0x94   :  { %1200 = vmatprep.subr.bf16.mxu0 %v1199_v47  ;;  %v464_v47 = vld [vmem:[#allocation8 + $0x3e8] sm:$0xff]  ;;  %v1213_v48 = vpack.c.bf16 %v456_v40, %v453_v39 }
  0x95   :  { %v491_v39 = vsub.s32 1, %v486_v35 }
  0x96   :  { %1262 = vmatpush3.bf16.msra.mxu1 %v1261_v43  ;;  %v1519_v43 = vpack.c.bf16 %v458_v37, %v455_v36  ;;  %v487_v36 = vsub.s32 0, %v486_v35  ;;  %v495_v37 = vsub.s32 2, %v486_v35 }
  0x97   :  { %1295 = vmatprep.subr.bf16.mxu1 %v1502_v49 }
 0x12c   :  { %v899_v50 = vpop.f32.mrb[0].mxu1 }
 0x12d   :  { %v900_v51 = vpop.f32.mrb[1].mxu1 }
 0x12e   :  { %v901_v52 = vadd.f32 %v900_v51, %v899_v50  ;;  %v459_v50 = vld [vmem:[#allocation8 + $0x3c0] sm:$0xff]  ;;  %v1215_v51 = vpack.c.bf16 %v463_v45, %v460_v44 }
 0x130   :  { %v902_v53 = vpop.f32.mrb[2].mxu1  ;;  %v212_v2 = vadd.f32 %v901_v52, %v866_v62  ;;  %v462_v52 = vld [vmem:[#allocation8 + $0x3d8] sm:$0xff] }
 0x131   :  { %v903_v54 = vpop.f32.mrb[3].mxu1 }
 0x132   :  { %v904_v55 = vadd.f32 %v903_v54, %v902_v53  ;;  %v466_v53 = vld [vmem:[#allocation8 + $0x3f8] sm:$0xff]  ;;  %v469_v54 = vld [vmem:[#allocation8 + $0x410] sm:$0xff] }
 0x134   :  { %v905_v56 = vpop.f32.mrb[4].mxu1  ;;  %v217_v63 = vadd.f32 %v904_v55, %v866_v62 }
 0x135   :  { %v906_v57 = vpop.f32.mrb[5].mxu1 }
 0x136   :  { %v907_v58 = vadd.f32 %v906_v57, %v905_v56  ;;  %v1525_v56 = vpack.c.bf16 %v464_v47, %v461_v46  ;;  %v467_v57 = vld [vmem:[#allocation8 + $0x400] sm:$0xff] }
 0x138   :  { %v908_v59 = vpop.f32.mrb[6].mxu1  ;;  %v222_v8 = vadd.f32 %v907_v58, %v866_v62  ;;  %v470_v58 = vld [vmem:[#allocation8 + $0x418] sm:$0xff] }
 0x139   :  { %v909_v60 = vpop.f32.mrb[7].mxu1 }
 0x13a   :  { %v910_v61 = vadd.f32 %v909_v60, %v908_v59  ;;  %v1217_v60 = vpack.c.bf16 %v462_v52, %v459_v50 }
 0x13c   :  { %v227_v6 = vadd.f32 %v910_v61, %v866_v62  ;;  %v1219_v61 = vpack.c.bf16 %v469_v54, %v466_v53  ;;  %v1283_v62 = vpack.c.bf16 %v470_v58, %v467_v57 }
 0x14c   :  { %v1029_v1 = vpop.f32.mrb[8].mxu1 }
 0x14d   :  { %v302_v3 = vadd.f32 %v1029_v1, %v217_v63  ;;  %v296_v4 = vpop.f32.mrb[9].mxu1  ;;  %v465_v63 = vld [vmem:[#allocation8 + $0x3f0] sm:$0xff]  ;;  %v468_v1 = vld [vmem:[#allocation8 + $0x408] sm:$0xff] }
 0x14e   :  { %v297_v5 = vadd.f32 %v296_v4, %v212_v2  ;;  %v472_v2 = vld [vmem:[#allocation8 + $0x428] sm:$0xff]  ;;  %v473_v4 = vld [vmem:[#allocation8 + $0x430] sm:$0xff] }
 0x14f   :  { %324 = vst [vmem:[#allocation3 + $0x10] sm:$0xff] %v302_v3 }
 0x150   :  { %323 = vst [vmem:[#allocation3 + $0x8] sm:$0xff] %v297_v5  ;;  %v1032_v7 = vpop.f32.mrb[10].mxu1  ;;  %564 = vmatprep.mubr.f32.mxu0 %v297_v5  ;;  %742 = vmatprep.mubr.f32.mxu1 %v297_v5  ;;  %v476_v5 = vld [vmem:[#allocation8 + $0x448] sm:$0xff] }
 0x151   :  { %v1508_v9 = vadd.f32 %v1032_v7, %v227_v6  ;;  %v306_v10 = vpop.f32.mrb[11].mxu1  ;;  %v1221_v6 = vpack.c.bf16 %v468_v1, %v465_v63 }
 0x152   :  { %v307_v11 = vadd.f32 %v306_v10, %v222_v8  ;;  %v1287_v8 = vpack.c.bf16 %v476_v5, %v473_v4  ;;  %v474_v10 = vld [vmem:[#allocation8 + $0x438] sm:$0xff] }
 0x153   :  { %326 = vst [vmem:[#allocation3 + $0x30] sm:$0xff] %v1508_v9 }
 0x154   :  { %325 = vst [vmem:[#allocation3 + $0x28] sm:$0xff] %v307_v11 }
 0x156   :  { %v336_v24 = vld [vmem:[#allocation3 + $0x13] sm:$0xff] }
 0x157   :  { %v327_v21 = vld [vmem:[#allocation3 + $0x5] sm:$0xff]  ;;  %v328_v31 = vld [vmem:[#allocation3 + $0xd] sm:$0xff] }
 0x158   :  { %565 = vmatmul.mubr.f32.vlgmr.msra.gmra.mrb[0].mxu0 %v327_v21  ;;  %743 = vmatmul.mubr.f32.vlgmr.msra.gmra.mrb[12].mxu1 %v327_v21  ;;  %v335_v21 = vld [vmem:[#allocation3 + $0xb] sm:$0xff] }
 0x159   :  { %1202 = vmatpush1.bf16.msra.mxu0 %v1201_v18  ;;  %1303 = vmatpush3.bf16.msra.mxu1 %v1502_v49  ;;  %v477_v18 = vld [vmem:[#allocation8 + $0x450] sm:$0xff] }
 0x15a   :  { %570 = vmatprep.mubr.f32.mxu0 %v302_v3  ;;  %747 = vmatprep.mubr.f32.mxu1 %v302_v3  ;;  %v475_v3 = vld [vmem:[#allocation8 + $0x440] sm:$0xff]  ;;  %v1229_v20 = vpack.c.bf16 %v480_v19, %v477_v18 }
 0x15b   :  { %1204 = vmatprep.subr.bf16.mxu0 %v1203_v22  ;;  %1296 = vmatprep.subr.bf16.mxu1 %v1511_v23  ;;  %v329_v41 = vld [vmem:[#allocation3 + $0x25] sm:$0xff]  ;;  %v330_v55 = vld [vmem:[#allocation3 + $0x2d] sm:$0xff]  ;;  %v1223_v7 = vpack.c.bf16 %v475_v3, %v472_v2 }
 0x15c   :  { %571 = vmatmul.mubr.f32.gmra.mrb[2].mxu0 %v328_v31  ;;  %748 = vmatmul.mubr.f32.gmra.mrb[14].mxu1 %v328_v31  ;;  %v337_v59 = vld [vmem:[#allocation3 + $0x2b] sm:$0xff]  ;;  %v338_v22 = vld [vmem:[#allocation3 + $0x33] sm:$0xff] }
 0x15d   :  { %1206 = vmatpush1.bf16.msra.mxu0 %v1205_v28  ;;  %1304 = vmatpush3.bf16.msra.mxu1 %v1511_v23 }
 0x15e   :  { %576 = vmatprep.mubr.f32.mxu0 %v307_v11  ;;  %752 = vmatprep.mubr.f32.mxu1 %v307_v11  ;;  %v478_v11 = vld [vmem:[#allocation8 + $0x458] sm:$0xff] }
 0x15f   :  { %1208 = vmatprep.subr.bf16.mxu0 %v1207_v32  ;;  %1297 = vmatprep.subr.bf16.mxu1 %v1515_v33  ;;  %v1227_v16 = vpack.c.bf16 %v481_v12, %v478_v11 }
 0x160   :  { %577 = vmatmul.mubr.f32.gmra.mrb[4].mxu0 %v329_v41  ;;  %753 = vmatmul.mubr.f32.gmra.mrb[16].mxu1 %v329_v41 }
 0x161   :  { %1210 = vmatpush1.bf16.msra.mxu0 %v1209_v38  ;;  %1305 = vmatpush3.bf16.msra.mxu1 %v1515_v33  ;;  %v483_v38 = vld [vmem:[%s1587_s4] sm:$0x7] }
 0x162   :  { %582 = vmatprep.mubr.f32.mxu0 %v1508_v9  ;;  %757 = vmatprep.mubr.f32.mxu1 %v1508_v9  ;;  %v471_v9 = vld [vmem:[#allocation8 + $0x420] sm:$0xff]  ;;  %v488_v40 = vrot.slane %v483_v38, %v487_v36  ;;  %v496_v41 = vrot.slane %v483_v38, %v495_v37 }
 0x163   :  { %1212 = vmatprep.subr.bf16.mxu0 %v1211_v42  ;;  %1298 = vmatprep.subr.bf16.mxu1 %v1519_v43  ;;  %v1225_v15 = vpack.c.bf16 %v474_v10, %v471_v9  ;;  %v492_v42 = vrot.slane %v483_v38, %v491_v39 }
 0x164   :  { %583 = vmatmul.mubr.f32.gmra.mrb[6].mxu0 %v330_v55  ;;  %758 = vmatmul.mubr.f32.gmra.mrb[18].mxu1 %v330_v55 }
 0x165   :  { %1214 = vmatpush1.bf16.msra.mxu0 %v1213_v48  ;;  %1306 = vmatpush3.bf16.msra.mxu1 %v1519_v43 }
 0x166   :  { %1068 = vmatprep.mubr.f32.mxu1 %v337_v59  ;;  %1216 = vmatprep.subr.bf16.mxu0 %v1215_v51 }
 0x167   :  { %1299 = vmatprep.subr.bf16.mxu1 %v1525_v56  ;;  %653 = vmatprep.mubr.f32.mxu0 %v1412_v0 }
 0x169   :  { %1218 = vmatpush1.bf16.msra.mxu0 %v1217_v60  ;;  %1307 = vmatpush3.bf16.msra.mxu1 %v1525_v56 }
 0x16a   :  { %1220 = vmatprep.subr.bf16.mxu0 %v1219_v61  ;;  %1300 = vmatprep.subr.bf16.mxu1 %v1283_v62 }
 0x16d   :  { %1222 = vmatpush1.bf16.msra.mxu0 %v1221_v6  ;;  %1308 = vmatpush3.bf16.msra.mxu1 %v1283_v62 }
 0x16e   :  { %1224 = vmatprep.subr.bf16.mxu0 %v1223_v7  ;;  %1301 = vmatprep.subr.bf16.mxu1 %v1287_v8 }
 0x171   :  { %1226 = vmatpush1.bf16.msra.mxu0 %v1225_v15  ;;  %1309 = vmatpush3.bf16.msra.mxu1 %v1287_v8 }
 0x172   :  { %1228 = vmatprep.subr.bf16.mxu0 %v1227_v16  ;;  %1302 = vmatprep.subr.bf16.mxu1 %v1291_v17 }
 0x175   :  { %1230 = vmatpush1.bf16.msra.mxu0 %v1229_v20  ;;  %1310 = vmatpush3.bf16.msra.mxu1 %v1291_v17 }
 0x176   :  { %1264 = vmatprep.subr.bf16.mxu0 %v1502_v49 }
 0x178   :  { %654 = vmatmul.mubr.f32.vlgmr.msra.gmra.mrb[0].mxu0 %v335_v21  ;;  %1069 = vmatmul.mubr.f32.vlgmr.msra.gmra.mrb[20].mxu1 %v338_v22 }
 0x179   :  { %1266 = vmatpush3.bf16.msra.mxu0 %v1502_v49  ;;  %659 = vmatprep.mubr.f32.mxu0 %v1412_v0 }
 0x17a   :  { %1268 = vmatprep.subr.bf16.mxu0 %v1511_v23 }
 0x17c   :  { %660 = vmatmul.mubr.f32.gmra.mrb[2].mxu0 %v336_v24 }
 0x17d   :  { %1270 = vmatpush3.bf16.msra.mxu0 %v1511_v23  ;;  %665 = vmatprep.mubr.f32.mxu0 %v1412_v0 }
 0x17e   :  { %1272 = vmatprep.subr.bf16.mxu0 %v1515_v33 }
 0x180   :  { %666 = vmatmul.mubr.f32.gmra.mrb[4].mxu0 %v337_v59 }
 0x181   :  { %1274 = vmatpush3.bf16.msra.mxu0 %v1515_v33  ;;  %671 = vmatprep.mubr.f32.mxu0 %v1412_v0 }
 0x182   :  { %1276 = vmatprep.subr.bf16.mxu0 %v1519_v43 }
 0x184   :  { %672 = vmatmul.mubr.f32.gmra.mrb[6].mxu0 %v338_v22 }
 0x185   :  { %1278 = vmatpush3.bf16.msra.mxu0 %v1519_v43  ;;  %1065 = vmatprep.mubr.f32.mxu0 %v335_v21 }
 0x186   :  { %1280 = vmatprep.subr.bf16.mxu0 %v1525_v56 }
 0x189   :  { %1282 = vmatpush3.bf16.msra.mxu0 %v1525_v56 }
 0x18a   :  { %1284 = vmatprep.subr.bf16.mxu0 %v1283_v62 }
 0x18d   :  { %1286 = vmatpush3.bf16.msra.mxu0 %v1283_v62 }
 0x18e   :  { %1288 = vmatprep.subr.bf16.mxu0 %v1287_v8 }
 0x191   :  { %1290 = vmatpush3.bf16.msra.mxu0 %v1287_v8 }
 0x192   :  { %1292 = vmatprep.subr.bf16.mxu0 %v1291_v17 }
 0x195   :  { %1294 = vmatpush3.bf16.msra.mxu0 %v1291_v17 }
 0x198   :  { %1066 = vmatmul.mubr.f32.vlgmr.msra.gmra.mrb[8].mxu0 %v336_v24 }
 0x22b   :  { %v963_v49 = vpop.f32.mrb[12].mxu1 }
 0x22c   :  { %v964_v23 = vpop.f32.mrb[13].mxu1 }
 0x22d   :  { %v965_v0 = vadd.f32 %v964_v23, %v963_v49 }
 0x22f   :  { %v966_v25 = vpop.f32.mrb[14].mxu1  ;;  %v745_v5 = vadd.f32 %v965_v0, %v496_v41 }
 0x230   :  { %v967_v26 = vpop.f32.mrb[15].mxu1 }
 0x231   :  { %v968_v27 = vadd.f32 %v967_v26, %v966_v25 }
 0x233   :  { %v969_v28 = vpop.f32.mrb[16].mxu1  ;;  %v750_v3 = vadd.f32 %v968_v27, %v496_v41 }
 0x234   :  { %v970_v29 = vpop.f32.mrb[17].mxu1 }
 0x235   :  { %v971_v30 = vadd.f32 %v970_v29, %v969_v28 }
 0x237   :  { %v972_v31 = vpop.f32.mrb[18].mxu1  ;;  %v755_v46 = vadd.f32 %v971_v30, %v496_v41 }
 0x238   :  { %v973_v32 = vpop.f32.mrb[19].mxu1 }
 0x239   :  { %v974_v33 = vadd.f32 %v973_v32, %v972_v31 }
 0x23b   :  { %v760_v43 = vadd.f32 %v974_v33, %v496_v41 }
 0x24b   :  { %v655_v44 = vpop.f32.mrb[0].mxu0  ;;  %v1070_v45 = vpop.f32.mrb[20].mxu1 }
 0x24c   :  { %v1311_v47 = vadd.f32 %v655_v44, %v488_v40  ;;  %v845_v48 = vadd.f32 %v1070_v45, %v760_v43  ;;  %v657_v50 = vpop.f32.mrb[1].mxu0  ;;  %v839_v51 = vpop.f32.mrb[21].mxu1 }
 0x24d   :  { %v1312_v52 = vadd.f32 %v657_v50, %v492_v42  ;;  %v840_v53 = vadd.f32 %v839_v51, %v755_v46 }
 0x24e   :  { %848 = vst [vmem:[%s1588_s5] sm:$0xff] %v1311_v47  ;;  %859 = vst [vmem:[%s1588_s5 + $0x58] sm:$0xff] %v845_v48 }
 0x24f   :  { %849 = vst [vmem:[%s1588_s5 + $0x8] sm:$0xff] %v1312_v52  ;;  %856 = vst [vmem:[%s1588_s5 + $0x40] sm:$0xff] %v840_v53  ;;  %v661_v54 = vpop.f32.mrb[2].mxu0 }
 0x250   :  { %v1313_v55 = vadd.f32 %v661_v54, %v488_v40  ;;  %v663_v56 = vpop.f32.mrb[3].mxu0 }
 0x251   :  { %v1314_v57 = vadd.f32 %v663_v56, %v492_v42 }
 0x252   :  { %851 = vst [vmem:[%s1588_s5 + $0x18] sm:$0xff] %v1313_v55 }
 0x253   :  { %852 = vst [vmem:[%s1588_s5 + $0x20] sm:$0xff] %v1314_v57  ;;  %v667_v58 = vpop.f32.mrb[4].mxu0 }
 0x254   :  { %v1315_v59 = vadd.f32 %v667_v58, %v488_v40  ;;  %v669_v60 = vpop.f32.mrb[5].mxu0 }
 0x255   :  { %v1316_v61 = vadd.f32 %v669_v60, %v492_v42 }
 0x256   :  { %854 = vst [vmem:[%s1588_s5 + $0x30] sm:$0xff] %v1315_v59 }
 0x257   :  { %855 = vst [vmem:[%s1588_s5 + $0x38] sm:$0xff] %v1316_v61  ;;  %v673_v62 = vpop.f32.mrb[6].mxu0 }
 0x258   :  { %v1317_v63 = vadd.f32 %v673_v62, %v488_v40  ;;  %v675_v1 = vpop.f32.mrb[7].mxu0 }
 0x259   :  { %v1318_v2 = vadd.f32 %v675_v1, %v492_v42 }
 0x25a   :  { %857 = vst [vmem:[%s1588_s5 + $0x48] sm:$0xff] %v1317_v63 }
 0x25b   :  { %858 = vst [vmem:[%s1588_s5 + $0x50] sm:$0xff] %v1318_v2 }
 0x26b   :  { %v1067_v4 = vpop.f32.mrb[8].mxu0 }
 0x26c   :  { %v835_v6 = vadd.f32 %v1067_v4, %v750_v3  ;;  %v829_v7 = vpop.f32.mrb[9].mxu0 }
 0x26d   :  { %v830_v8 = vadd.f32 %v829_v7, %v745_v5 }
 0x26e   :  { %853 = vst [vmem:[%s1588_s5 + $0x28] sm:$0xff] %v835_v6 }
 0x26f   :  { %850 = vst [vmem:[%s1588_s5 + $0x10] sm:$0xff] %v830_v8 }
 0x270   :  { %864 = vsyncpa [#allocation5], 1 }
 0x271   :  { %865 = vsyncpa [#allocation7], 1 }

</bundles_post_ra>
